<compile_context>
chip_gen: v7x
topology: tpu7x:2x2x1
jax: 0.10.0
libtpu: 0.0.40
codegen_flags: <defaults>
</compile_context>

<pallas_src>
import functools

import jax
import jax.numpy as jnp
from jax.experimental import pallas as pl
from jax.experimental.pallas import tpu as pltpu


def _round_up(n, m):
    return ((n + m - 1) // m) * m


def _fcn_kernel(n_hidden_layers, input_is_scalar,
                x_ref, w0_ref, b0_ref, wh_ref, bh_ref, we_ref, be_ref,
                out_ref):
    x = x_ref[...]  # (N_Input, tile_b), f32, batch along lanes

    # --- First layer: Linear(N_Input -> H) + tanh ---
    if input_is_scalar:
        # (H, 1) * (1, tile_b) broadcast on the VPU; avoids a K=1 MXU contraction.
        h = jnp.tanh(w0_ref[...] * x + b0_ref[...])
    else:
        h = jnp.tanh(jnp.dot(w0_ref[...], x, preferred_element_type=jnp.float32)
                     + b0_ref[...])

    # --- Hidden layers: (N_Layers - 1) x [Linear(H -> H) + tanh] ---
    # h stays (H, tile_b); weights (H, H) are the small LHS on the MXU.
    for l in range(n_hidden_layers):
        h = jnp.tanh(jnp.dot(wh_ref[l], h, preferred_element_type=jnp.float32)
                     + bh_ref[l])

    # --- Final layer: Linear(H -> N_Output), no activation ---
    # Even for N_Output == 1 this is a (1, H)@(H, tile_b) MXU matmul (MXU has slack),
    # producing a lane-dense (N_Output, tile_b) output slab.
    y = jnp.dot(we_ref[...], h, preferred_element_type=jnp.float32) + be_ref[...]
    out_ref[...] = y.astype(out_ref.dtype)


def fcn_forward(x, params, *, block_cols=8192):
    """Batch-tiled (lane-major) Pallas FCN forward.

    x: (batch, N_Input) f32, as in torch. Internally transposed to (N_Input, batch)
    so batch runs along lanes; block_cols = batch rows per grid step (multiple of 128).
    """
    w0, b0, wh, bh, we, be = params
    batch, n_in = x.shape
    n_hidden = w0.shape[0]
    n_out = we.shape[0]
    n_hidden_layers = wh.shape[0]
    input_is_scalar = (n_in == 1)

    # Batch tile: multiple of 128 lanes. Prefer >= 2 grid steps so the "parallel"
    # grid axis can shard across v7x's two TensorCores.
    batch_lane = _round_up(batch, 128)
    tb = min(block_cols, batch_lane)
    if batch_lane // tb < 2 and tb > 128:
        tb = _round_up((tb + 1) // 2, 128)
    batch_p = _round_up(batch, tb)
    grid = (batch_p // tb,)

    # Transpose to lane-major; free reshape when N_Input == 1 (the common PINN case).
    xT = jnp.transpose(x.astype(jnp.float32))
    if batch_p != batch:
        # Zero-padded columns compute harmless finite garbage and are sliced off below.
        xT = jnp.pad(xT, ((0, 0), (0, batch_p - batch)))

    itemsize = lambda a: a.size * a.dtype.itemsize
    cost = pl.CostEstimate(
        flops=2 * batch_p * (n_in * n_hidden
                             + n_hidden_layers * n_hidden * n_hidden
                             + n_hidden * n_out),
        transcendentals=batch_p * n_hidden * (n_hidden_layers + 1),
        bytes_accessed=(itemsize(xT) + batch_p * n_out * 4
                        + sum(itemsize(a) for a in (w0, b0, wh, bh, we, be))),
    )

    kernel = functools.partial(_fcn_kernel, n_hidden_layers, input_is_scalar)

    out_t = pl.pallas_call(
        kernel,
        out_shape=jax.ShapeDtypeStruct((n_out, batch_p), jnp.float32),
        grid=grid,
        in_specs=[
            pl.BlockSpec((n_in, tb), lambda i: (0, i)),     # x^T: batch-tiled on lanes
            pl.BlockSpec(w0.shape, lambda i: (0, 0)),       # weights/biases VMEM-resident
            pl.BlockSpec(b0.shape, lambda i: (0, 0)),
            pl.BlockSpec(wh.shape, lambda i: (0, 0, 0)),
            pl.BlockSpec(bh.shape, lambda i: (0, 0, 0)),
            pl.BlockSpec(we.shape, lambda i: (0, 0)),
            pl.BlockSpec(be.shape, lambda i: (0, 0)),
        ],
        out_specs=pl.BlockSpec((n_out, tb), lambda i: (0, i)),   # lane-dense output slab
        compiler_params=pltpu.CompilerParams(
            dimension_semantics=("parallel",)),
        cost_estimate=cost,
    )(xT, w0, b0, wh, bh, we, be)

    # Back to torch-style (batch, N_Output); free reshape when N_Output == 1.
    return jnp.transpose(out_t[:, :batch])


def init_params(key, n_input, n_output, n_hidden, n_layers):
    """Deterministic init mimicking torch.nn.Linear default (U(-1/sqrt(fan_in), +)).

    Weights are stored in PyTorch's native (out_features, in_features) layout;
    biases as (out_features, 1) columns (lane-major layout used by the kernel).
    """
    ks = jax.random.split(key, 6)

    def unif(k, shape, fan_in):
        bound = 1.0 / jnp.sqrt(float(fan_in))
        return jax.random.uniform(k, shape, jnp.float32, -bound, bound)

    n_hl = n_layers - 1
    w0 = unif(ks[0], (n_hidden, n_input), n_input)               # (H, Din)
    b0 = unif(ks[1], (n_hidden, 1), n_input)                     # (H, 1)
    wh = unif(ks[2], (n_hl, n_hidden, n_hidden), n_hidden)       # (L-1, H, H)
    bh = unif(ks[3], (n_hl, n_hidden, 1), n_hidden)              # (L-1, H, 1)
    we = unif(ks[4], (n_output, n_hidden), n_hidden)             # (Dout, H)
    be = unif(ks[5], (n_output, 1), n_hidden)                    # (Dout, 1)
    return (w0, b0, wh, bh, we, be)


def fcn_reference(x, params):
    """Pure-JAX reference matching the PyTorch FCN forward (y = x @ W^T + b)."""
    w0, b0, wh, bh, we, be = params
    h = jnp.tanh(x @ w0.T + b0.T)
    for l in range(wh.shape[0]):
        h = jnp.tanh(h @ wh[l].T + bh[l].T)
    return h @ we.T + be.T


if __name__ == "__main__":
    # FCN(N_Input=1, N_Output=1, N_Hidden=32, N_Layers=3) — typical PINN sizes.
    N_INPUT, N_OUTPUT, N_HIDDEN, N_LAYERS = 1, 1, 32, 3

    key = jax.random.PRNGKey(0)
    k_x, k_p, k_x2 = jax.random.split(key, 3)
    params = init_params(k_p, N_INPUT, N_OUTPUT, N_HIDDEN, N_LAYERS)

    # 1) Small batch: pads to a single 128-lane tile; exact-ish f32 check.
    x_small = jax.random.uniform(k_x, (8, N_INPUT), jnp.float32)
    out_small = fcn_forward(x_small, params)
    jax.block_until_ready(out_small)
    ref_small = fcn_reference(x_small, params)
    assert out_small.shape == (8, N_OUTPUT)
    assert jnp.allclose(out_small, ref_small, atol=1e-4, rtol=1e-4)

    # 2) Larger, non-multiple-of-tile batch: exercises the >=2-step "parallel" grid
    #    (v7x both-TC path), lane-dim padding/slicing, and lane-dense output stores.
    x_big = jax.random.uniform(k_x2, (2000, N_INPUT), jnp.float32)
    out_big = fcn_forward(x_big, params)
    jax.block_until_ready(out_big)
    ref_big = fcn_reference(x_big, params)
    assert out_big.shape == (2000, N_OUTPUT)
    assert jnp.allclose(out_big, ref_big, atol=1e-4, rtol=1e-4)

    print("KERNEL_OK")
</pallas_src>

<mosaic_0001>
module attributes {stable_mosaic.version = 11 : i64} {
  func.func @_fcn_kernel(%arg0: i32, %arg1: memref<1x128xf32, #tpu.memory_space<vmem>>, %arg2: memref<32x1xf32, #tpu.memory_space<vmem>>, %arg3: memref<32x1xf32, #tpu.memory_space<vmem>>, %arg4: memref<2x32x32xf32, #tpu.memory_space<vmem>>, %arg5: memref<2x32x1xf32, #tpu.memory_space<vmem>>, %arg6: memref<1x32xf32, #tpu.memory_space<vmem>>, %arg7: memref<1x1xf32, #tpu.memory_space<vmem>>, %arg8: memref<1x128xf32, #tpu.memory_space<vmem>>) attributes {dimension_semantics = [#tpu.dimension_semantics<parallel>], iteration_bounds = array<i64: 1>, scalar_prefetch = 0 : i64, scratch_operands = 0 : i64, tpu.core_type = #tpu.core_type<tc>, window_params = [{transform_indices = @transform_0, window_bounds = array<i64: 1, 128>}, {pipeline_mode = #tpu.pipeline_mode<synchronous>, transform_indices = @transform_1, window_bounds = array<i64: 32, 1>}, {pipeline_mode = #tpu.pipeline_mode<synchronous>, transform_indices = @transform_2, window_bounds = array<i64: 32, 1>}, {pipeline_mode = #tpu.pipeline_mode<synchronous>, transform_indices = @transform_3, window_bounds = array<i64: 2, 32, 32>}, {pipeline_mode = #tpu.pipeline_mode<synchronous>, transform_indices = @transform_4, window_bounds = array<i64: 2, 32, 1>}, {pipeline_mode = #tpu.pipeline_mode<synchronous>, transform_indices = @transform_5, window_bounds = array<i64: 1, 32>}, {pipeline_mode = #tpu.pipeline_mode<synchronous>, transform_indices = @transform_6, window_bounds = array<i64: 1, 1>}, {transform_indices = @transform_7, window_bounds = array<i64: 1, 128>}]} {
    %c0 = arith.constant 0 : index
    %c0_0 = arith.constant 0 : index
    %0 = vector.load %arg1[%c0, %c0_0] : memref<1x128xf32, #tpu.memory_space<vmem>>, vector<1x128xf32>
    %c0_1 = arith.constant 0 : index
    %c0_2 = arith.constant 0 : index
    %1 = vector.load %arg2[%c0_1, %c0_2] : memref<32x1xf32, #tpu.memory_space<vmem>>, vector<32x1xf32>
    %2 = vector.broadcast %1 : vector<32x1xf32> to vector<32x128xf32>
    %3 = vector.broadcast %0 : vector<1x128xf32> to vector<32x128xf32>
    %4 = arith.mulf %2, %3 : vector<32x128xf32>
    %c0_3 = arith.constant 0 : index
    %c0_4 = arith.constant 0 : index
    %5 = vector.load %arg3[%c0_3, %c0_4] : memref<32x1xf32, #tpu.memory_space<vmem>>, vector<32x1xf32>
    %6 = vector.broadcast %5 : vector<32x1xf32> to vector<32x128xf32>
    %7 = arith.addf %4, %6 : vector<32x128xf32>
    %8 = math.tanh %7 : vector<32x128xf32>
    %c0_5 = arith.constant 0 : index
    %c0_6 = arith.constant 0 : index
    %c0_7 = arith.constant 0 : index
    %9 = vector.load %arg4[%c0_5, %c0_6, %c0_7] : memref<2x32x32xf32, #tpu.memory_space<vmem>>, vector<1x32x32xf32>
    %10 = vector.shape_cast %9 : vector<1x32x32xf32> to vector<32x32xf32>
    %cst = arith.constant dense<0.000000e+00> : vector<32x128xf32>
    %11 = tpu.matmul %10, %8, %cst {dimension_numbers = #tpu.dot_dimension_numbers<[1], [0], [0], [1], [0, 0, 1, 1], [], []>} : vector<32x32xf32>, vector<32x128xf32>, vector<32x128xf32> -> vector<32x128xf32>
    %c0_8 = arith.constant 0 : index
    %c0_9 = arith.constant 0 : index
    %c0_10 = arith.constant 0 : index
    %12 = vector.load %arg5[%c0_8, %c0_9, %c0_10] : memref<2x32x1xf32, #tpu.memory_space<vmem>>, vector<1x32x1xf32>
    %13 = vector.shape_cast %12 : vector<1x32x1xf32> to vector<32x1xf32>
    %14 = vector.broadcast %13 : vector<32x1xf32> to vector<32x128xf32>
    %15 = arith.addf %11, %14 : vector<32x128xf32>
    %16 = math.tanh %15 : vector<32x128xf32>
    %c1 = arith.constant 1 : index
    %c0_11 = arith.constant 0 : index
    %c0_12 = arith.constant 0 : index
    %17 = vector.load %arg4[%c1, %c0_11, %c0_12] : memref<2x32x32xf32, #tpu.memory_space<vmem>>, vector<1x32x32xf32>
    %18 = vector.shape_cast %17 : vector<1x32x32xf32> to vector<32x32xf32>
    %cst_13 = arith.constant dense<0.000000e+00> : vector<32x128xf32>
    %19 = tpu.matmul %18, %16, %cst_13 {dimension_numbers = #tpu.dot_dimension_numbers<[1], [0], [0], [1], [0, 0, 1, 1], [], []>} : vector<32x32xf32>, vector<32x128xf32>, vector<32x128xf32> -> vector<32x128xf32>
    %c1_14 = arith.constant 1 : index
    %c0_15 = arith.constant 0 : index
    %c0_16 = arith.constant 0 : index
    %20 = vector.load %arg5[%c1_14, %c0_15, %c0_16] : memref<2x32x1xf32, #tpu.memory_space<vmem>>, vector<1x32x1xf32>
    %21 = vector.shape_cast %20 : vector<1x32x1xf32> to vector<32x1xf32>
    %22 = vector.broadcast %21 : vector<32x1xf32> to vector<32x128xf32>
    %23 = arith.addf %19, %22 : vector<32x128xf32>
    %24 = math.tanh %23 : vector<32x128xf32>
    %c0_17 = arith.constant 0 : index
    %c0_18 = arith.constant 0 : index
    %25 = vector.load %arg6[%c0_17, %c0_18] : memref<1x32xf32, #tpu.memory_space<vmem>>, vector<1x32xf32>
    %cst_19 = arith.constant dense<0.000000e+00> : vector<1x128xf32>
    %26 = tpu.matmul %25, %24, %cst_19 {dimension_numbers = #tpu.dot_dimension_numbers<[1], [0], [0], [1], [0, 0, 1, 1], [], []>} : vector<1x32xf32>, vector<32x128xf32>, vector<1x128xf32> -> vector<1x128xf32>
    %c0_20 = arith.constant 0 : index
    %c0_21 = arith.constant 0 : index
    %27 = vector.load %arg7[%c0_20, %c0_21] : memref<1x1xf32, #tpu.memory_space<vmem>>, vector<1x1xf32>
    %28 = vector.broadcast %27 : vector<1x1xf32> to vector<1x128xf32>
    %29 = arith.addf %26, %28 : vector<1x128xf32>
    %c0_22 = arith.constant 0 : index
    %c0_23 = arith.constant 0 : index
    %30 = vector.load %arg8[%c0_22, %c0_23] : memref<1x128xf32, #tpu.memory_space<vmem>>, vector<1x128xf32>
    tpu.vector_store %arg8[%c0_22, %c0_23], %29 {strides = array<i32>} : memref<1x128xf32, #tpu.memory_space<vmem>>, vector<1x128xf32>,
    return
  }
  func.func @transform_0(%arg0: i32) -> (i32, i32) {
    %c0_i32 = arith.constant 0 : i32
    %c0_i32_0 = arith.constant 0 : i32
    return %c0_i32, %arg0 : i32, i32
  }
  func.func @transform_1(%arg0: i32) -> (i32, i32) {
    %c0_i32 = arith.constant 0 : i32
    %c0_i32_0 = arith.constant 0 : i32
    %c0_i32_1 = arith.constant 0 : i32
    return %c0_i32, %c0_i32_0 : i32, i32
  }
  func.func @transform_2(%arg0: i32) -> (i32, i32) {
    %c0_i32 = arith.constant 0 : i32
    %c0_i32_0 = arith.constant 0 : i32
    %c0_i32_1 = arith.constant 0 : i32
    return %c0_i32, %c0_i32_0 : i32, i32
  }
  func.func @transform_3(%arg0: i32) -> (i32, i32, i32) {
    %c0_i32 = arith.constant 0 : i32
    %c0_i32_0 = arith.constant 0 : i32
    %c0_i32_1 = arith.constant 0 : i32
    %c0_i32_2 = arith.constant 0 : i32
    return %c0_i32, %c0_i32_0, %c0_i32_1 : i32, i32, i32
  }
  func.func @transform_4(%arg0: i32) -> (i32, i32, i32) {
    %c0_i32 = arith.constant 0 : i32
    %c0_i32_0 = arith.constant 0 : i32
    %c0_i32_1 = arith.constant 0 : i32
    %c0_i32_2 = arith.constant 0 : i32
    return %c0_i32, %c0_i32_0, %c0_i32_1 : i32, i32, i32
  }
  func.func @transform_5(%arg0: i32) -> (i32, i32) {
    %c0_i32 = arith.constant 0 : i32
    %c0_i32_0 = arith.constant 0 : i32
    %c0_i32_1 = arith.constant 0 : i32
    return %c0_i32, %c0_i32_0 : i32, i32
  }
  func.func @transform_6(%arg0: i32) -> (i32, i32) {
    %c0_i32 = arith.constant 0 : i32
    %c0_i32_0 = arith.constant 0 : i32
    %c0_i32_1 = arith.constant 0 : i32
    return %c0_i32, %c0_i32_0 : i32, i32
  }
  func.func @transform_7(%arg0: i32) -> (i32, i32) {
    %c0_i32 = arith.constant 0 : i32
    %c0_i32_0 = arith.constant 0 : i32
    return %c0_i32, %arg0 : i32, i32
  }
}

</mosaic_0001>

<bundles_post_ra>
// kernel: tpu_custom_call.1
= control target key start
LH: loop header
LB: loop body
LE: loop exit
PB: predicated region body
PF: predicated region fallthrough
CT: control target
= control target key end

     0   :  { %s758_s0 = inlined_call_operand.vmem [shape: f32[1,128], index: 0, kind: input, shape index: {}]   ;;  %s759_s1 = inlined_call_operand.vmem [shape: f32[32,1], index: 1, kind: input, shape index: {}]   ;;  %s760_s2 = inlined_call_operand.vmem [shape: f32[32,1], index: 2, kind: input, shape index: {}]   ;;  %s761_s3 = inlined_call_operand.vmem [shape: f32[2,32,32], index: 3, kind: input, shape index: {}]   ;;  %s762_s4 = inlined_call_operand.vmem [shape: f32[2,32,1], index: 4, kind: input, shape index: {}]   ;;  %s763_s5 = inlined_call_operand.vmem [shape: f32[1,32], index: 5, kind: input, shape index: {}]   ;;  %s764_s6 = inlined_call_operand.<no memory space> [shape: f32[1,1], index: 6, kind: input, shape index: {}]   ;;  %s765_s7 = inlined_call_operand.hbm [shape: f32[1,128], index: 7, kind: output, shape index: {}]  }
   0x1   :  { %v12_v0 = vstv %s764_s6 }
   0x2   :  { %13 = vst [vmem:[#allocation2] sm:$0x1] %v12_v0 }
   0x3   :  { %v64_v1 = vld [vmem:[%s760_s2] sm:$0xff]  ;;  %v611_v3 = vmov 0   ;;  %v65_v4 = vld [vmem:[%s760_s2 + $0x8] sm:$0xff] }
   0x4   :  { %v30_v2 = vld [vmem:[%s759_s1] sm:$0xff]  ;;  %562 = vset.pattern.permute.xlu1 %v611_v3  ;;  %561 = vset.pattern.permute.xlu0 %v611_v3  ;;  %v31_v5 = vld [vmem:[%s759_s1 + $0x8] sm:$0xff] }
   0x5   :  { %70 = vperm.xlu1 %562, %v64_v1   ;;  %36 = vperm.xlu0 %561, %v30_v2  }
   0x9   :  { %75 = vperm.xlu1 %562, %v65_v4   ;;  %41 = vperm.xlu0 %561, %v31_v5  }
   0xa   :  { %14 = vsyncpa [#allocation4], 0  ;;  %v33_v6 = vld [vmem:[%s759_s1 + $0x18] sm:$0xff]  ;;  %v32_v7 = vld [vmem:[%s759_s1 + $0x10] sm:$0xff]  ;;  %vm124_vm0 = vcmask 261120   ;;  %v612_v4 = vmov 0.0|0.0  }
   0xb   :  { %v67_v8 = vld [vmem:[%s760_s2 + $0x18] sm:$0xff]  ;;  %v66_v9 = vld [vmem:[%s760_s2 + $0x10] sm:$0xff]  ;;  %v101_v10 = vld [vmem:[%s762_s4 + $0x8] sm:$0xff]  ;;  %vm613_vm1 = vmmov 0   ;;  %v614_v5 = vmov 0.0   ;;  %s615_s24 = smov [#allocation3]  }
   0xc   :  { %v100_v11 = vld [vmem:[%s762_s4] sm:$0xff]  ;;  %v103_v12 = vld [vmem:[%s762_s4 + $0x18] sm:$0xff]  ;;  %v102_v13 = vld [vmem:[%s762_s4 + $0x10] sm:$0xff]  ;;  %s448_s2 = sshll.u32 %s615_s24, 4  ;;  %s449_s2 = int_to_ptr.vmem [resolvable:$true] %s448_s2 }
   0xd   :  { %51 = vperm.xlu1 %562, %v33_v6   ;;  %46 = vperm.xlu0 %561, %v32_v7   ;;  %v466_v14 = vld [vmem:[%s762_s4 + $0x28] sm:$0xff]  ;;  %v465_v15 = vld [vmem:[%s762_s4 + $0x20] sm:$0xff]  ;;  %v468_v16 = vld [vmem:[%s762_s4 + $0x38] sm:$0xff]  ;;  %s587_s25 = scalar_lea.vmem %s449_s2, 16  ;;  %s591_s26 = scalar_lea.vmem %s449_s2, 32 }
   0xe   :  { %v467_v17 = vld [vmem:[%s762_s4 + $0x30] sm:$0xff]  ;;  %v358_v18 = vld [vmem:[#allocation2] sm:$0x1]  ;;  %v97_v43 = vld [vmem:[%s761_s3 + $0x8] sm:$0xff]  ;;  %p588_p0 = scmp.ne.s32.totalorder %s449_s2, %s587_s25  ;;  %p592_p1 = scmp.lt.s32.totalorder %s449_s2, %s449_s2 }
   0xf   :  { %v96_v19 = vld [vmem:[%s761_s3] sm:$0xff]  ;;  %v98_v44 = vld [vmem:[%s761_s3 + $0x10] sm:$0xff]  ;;  %v99_v45 = vld [vmem:[%s761_s3 + $0x18] sm:$0xff]  ;;  %p593_p2 = scmp.lt.s32.totalorder %s591_s26, %s587_s25 }
  0x10   :  { %503 = vmatprep.mubr.msk.f32.mxu0 %vm124_vm0, %v96_v19  ;;  %v456_v20 = vld [vmem:[%s758_s0] ss:$0 sm:$0xff]  ;;  %v462_v1 = vld [vmem:[%s761_s3 + $0x28] sm:$0xff]  ;;  %v463_v2 = vld [vmem:[%s761_s3 + $0x30] sm:$0xff] }
  0x11   :  { %85 = vperm.xlu1 %562, %v67_v8   ;;  %80 = vperm.xlu0 %561, %v66_v9   ;;  %v461_v46 = vld [vmem:[%s761_s3 + $0x20] sm:$0xff]  ;;  %v464_v3 = vld [vmem:[%s761_s3 + $0x38] sm:$0xff]  ;;  %p594_p3 = por %p593_p2, %p592_p1 }
  0x12   :  { %517 = vmatprep.mubr.msk.f32.mxu1 %vm124_vm0, %v461_v46 }
  0x13   :  { %p595_p4 = pnand %p594_p3, %p588_p0 }
  0x15   :  { %111 = vperm.xlu1 %562, %v101_v10   ;;  %106 = vperm.xlu0 %561, %v100_v11  }
  0x19   :  { %121 = vperm.xlu1 %562, %v103_v12   ;;  %116 = vperm.xlu0 %561, %v102_v13  }
  0x1d   :  { %243 = vperm.xlu1 %562, %v466_v14   ;;  %238 = vperm.xlu0 %561, %v465_v15  }
  0x21   :  { %253 = vperm.xlu1 %562, %v468_v16   ;;  %248 = vperm.xlu0 %561, %v467_v17  }
  0x25   :  { %361 = vperm.xlu0 %561, %v358_v18  }
  0x84   :  { %v71_v21 = vpop.permute.xlu1 %70  ;;  %v37_v22 = vpop.permute.xlu0 %36 }
  0x85   :  { %v60_v23 = vmul.f32 %v456_v20, %v37_v22 }
  0x87   :  { %v88_v24 = vadd.f32 %v71_v21, %v60_v23 }
  0x88   :  { %v76_v25 = vpop.permute.xlu1 %75  ;;  %v42_v26 = vpop.permute.xlu0 %41 }
  0x89   :  { %v61_v27 = vmul.f32 %v456_v20, %v42_v26  ;;  %563 = vtanh.f32 %v88_v24  ;;  %v357_v24 = vld [vmem:[%s763_s5] sm:$0x1] }
  0x8b   :  { %v89_v28 = vadd.f32 %v76_v25, %v61_v27  ;;  %v364_v25 = vlaneseq }
  0x8c   :  { %v52_v29 = vpop.permute.xlu1 %51  ;;  %v47_v30 = vpop.permute.xlu0 %46 }
  0x8d   :  { %565 = vtanh.f32 %v89_v28  ;;  %v63_v31 = vmul.f32 %v456_v20, %v52_v29  ;;  %v62_v32 = vmul.f32 %v456_v20, %v47_v30  ;;  %v365_v26 = vshrl.u32 %v364_v25, 7 }
  0x8f   :  { %v366_v27 = vsub.s32 0, %v365_v26 }
  0x90   :  { %v86_v33 = vpop.permute.xlu1 %85  ;;  %v81_v34 = vpop.permute.xlu0 %80 }
  0x91   :  { %v91_v35 = vadd.f32 %v86_v33, %v63_v31  ;;  %v90_v36 = vadd.f32 %v81_v34, %v62_v32 }
  0x93   :  { %567 = vtanh.f32 %v91_v35  ;;  %v564_v37 = vpop.eup %563 }
  0x94   :  { %569 = vtanh.f32 %v90_v36  ;;  %v112_v47 = vpop.permute.xlu1 %111  ;;  %v107_v48 = vpop.permute.xlu0 %106 }
  0x97   :  { %v566_v38 = vpop.eup %565 }
  0x98   :  { %v534_v39 = vpack.c.bf16 %v566_v38, %v564_v37  ;;  %v122_v53 = vpop.permute.xlu1 %121  ;;  %v117_v55 = vpop.permute.xlu0 %116 }
  0x9a   :  { %535 = vmatprep.subr.bf16.mxu0 %v534_v39 }
  0x9b   :  { %537 = vmatpush3.bf16.msra.mxu0 %v534_v39 }
  0x9c   :  { %v244_v6 = vpop.permute.xlu1 %243  ;;  %v239_v7 = vpop.permute.xlu0 %238 }
  0x9d   :  { %v568_v40 = vpop.eup %567 }
  0x9e   :  { %v570_v41 = vpop.eup %569 }
  0x9f   :  { %v538_v42 = vpack.c.bf16 %v568_v40, %v570_v41 }
  0xa0   :  { %v254_v12 = vpop.permute.xlu1 %253  ;;  %v249_v14 = vpop.permute.xlu0 %248 }
  0xa1   :  { %539 = vmatprep.subr.bf16.mxu0 %v538_v42 }
  0xa2   :  { %541 = vmatpush3.bf16.msra.mxu0 %v538_v42 }
  0xa3   :  { %550 = vmatprep.subr.bf16.mxu0 %v612_v4 }
  0xa4   :  { %v362_v28 = vpop.permute.xlu0 %361 }
  0xa5   :  { %504 = vmatmul.mubr.msk.f32.vlgmr.msra.gmra.mrb[0].mxu0 %vm124_vm0, %v97_v43  ;;  %v367_v29 = vrot.slane %v362_v28, %v366_v27 }
  0xa6   :  { %506 = vmatprep.mubr.msk.f32.mxu0 %vm124_vm0, %v98_v44 }
  0xa9   :  { %507 = vmatmul.mubr.msk.f32.gmra.mrb[2].mxu0 %vm124_vm0, %v99_v45 }
  0xaa   :  { %531 = vmatprep.mubr.msk.f32.mxu0 %vm613_vm1, %v614_v5 }
 0x178   :  { %v505_v49 = vpop.f32.mrb[0].mxu0 }
 0x179   :  { %v209_v50 = vadd.f32 %v505_v49, %v112_v47  ;;  %v203_v51 = vpop.f32.mrb[1].mxu0 }
 0x17a   :  { %v204_v52 = vadd.f32 %v203_v51, %v107_v48 }
 0x17b   :  { %571 = vtanh.f32 %v209_v50 }
 0x17c   :  { %573 = vtanh.f32 %v204_v52  ;;  %v508_v54 = vpop.f32.mrb[2].mxu0 }
 0x17d   :  { %v219_v56 = vadd.f32 %v508_v54, %v122_v53  ;;  %v213_v57 = vpop.f32.mrb[3].mxu0 }
 0x17e   :  { %v214_v58 = vadd.f32 %v213_v57, %v117_v55 }
 0x17f   :  { %575 = vtanh.f32 %v219_v56 }
 0x180   :  { %577 = vtanh.f32 %v214_v58 }
 0x185   :  { %v572_v59 = vpop.eup %571 }
 0x186   :  { %v574_v60 = vpop.eup %573 }
 0x187   :  { %v542_v61 = vpack.c.bf16 %v572_v59, %v574_v60 }
 0x189   :  { %v576_v62 = vpop.eup %575  ;;  %543 = vmatprep.subr.bf16.mxu1 %v542_v61 }
 0x18a   :  { %v578_v63 = vpop.eup %577  ;;  %545 = vmatpush3.bf16.msra.mxu1 %v542_v61 }
 0x18b   :  { %v546_v0 = vpack.c.bf16 %v576_v62, %v578_v63 }
 0x18d   :  { %547 = vmatprep.subr.bf16.mxu1 %v546_v0 }
 0x18e   :  { %549 = vmatpush3.bf16.msra.mxu1 %v546_v0 }
 0x191   :  { %518 = vmatmul.mubr.msk.f32.vlgmr.msra.gmra.mrb[0].mxu1 %vm124_vm0, %v462_v1 }
 0x192   :  { %520 = vmatprep.mubr.msk.f32.mxu1 %vm124_vm0, %v463_v2 }
 0x195   :  { %521 = vmatmul.mubr.msk.f32.gmra.mrb[2].mxu1 %vm124_vm0, %v464_v3 }
 0x264   :  { %v519_v8 = vpop.f32.mrb[0].mxu1 }
 0x265   :  { %v340_v9 = vadd.f32 %v519_v8, %v244_v6  ;;  %v334_v10 = vpop.f32.mrb[1].mxu1 }
 0x266   :  { %v335_v11 = vadd.f32 %v334_v10, %v239_v7 }
 0x267   :  { %579 = vtanh.f32 %v340_v9 }
 0x268   :  { %581 = vtanh.f32 %v335_v11  ;;  %v522_v13 = vpop.f32.mrb[2].mxu1 }
 0x269   :  { %v350_v15 = vadd.f32 %v522_v13, %v254_v12  ;;  %v344_v16 = vpop.f32.mrb[3].mxu1 }
 0x26a   :  { %v345_v17 = vadd.f32 %v344_v16, %v249_v14 }
 0x26b   :  { %583 = vtanh.f32 %v350_v15 }
 0x26c   :  { %585 = vtanh.f32 %v345_v17 }
 0x271   :  { %v580_v18 = vpop.eup %579 }
 0x272   :  { %v582_v19 = vpop.eup %581 }
 0x273   :  { %v551_v20 = vpack.c.bf16 %v580_v18, %v582_v19 }
 0x275   :  { %v584_v21 = vpop.eup %583  ;;  %552 = vmatpush3.bf16.msra.mxu0 %v551_v20 }
 0x276   :  { %v586_v22 = vpop.eup %585  ;;  %553 = vmatprep.subr.bf16.mxu0 %v612_v4 }
 0x277   :  { %v554_v23 = vpack.c.bf16 %v584_v21, %v586_v22 }
 0x279   :  { %555 = vmatpush3.bf16.msra.mxu0 %v554_v23 }
 0x27c   :  { %532 = vmatmul.mubr.msk.f32.vlgmr.msra.gmra.mrb[4].mxu0 %vm124_vm0, %v357_v24 }
 0x34f   :  { %v437_v30 = vpop.f32.mrb[4].mxu0 }
 0x350   :  { %v438_v31 = vadd.f32 %v437_v30, %v367_v29  ;;  %v533_v32 = vpop.f32.mrb[5].mxu0 }
 0x352   :  { %441 = vst [vmem:[#allocation3] sm:$0x1] %v438_v31 }
 0x353   :  { %598 = shalt.err (!%p595_p4)
}
 0x354   :  { %s599_s28 = scalar_lea.hbm %s765_s7, 16 }
 0x355   :  { %p600_p5 = scmp.ne.s32.totalorder %s765_s7, %s599_s28  ;;  %p603_p6 = scmp.lt.u32.totalorder %s599_s28, %s765_s7 }
 0x357   :  { %p605_p7 = pnand %p603_p6, %p600_p5 }
 0x359   :  { %608 = shalt.err (!%p605_p7)
}
 0x35a   :  { %451 = dma.vmem_to_hbm [thread:$0]  %s449_s2, 16, %s765_s7, [#allocation4]  }
 0x35b   :  { %609 = dma.done.wait [#allocation4], 16  }
 0x35c   :  { %610 = vsyncadd [#allocation4], 4294967280 }
 0x35d   :  { %455 = vsyncpa [#allocation4], 1 }

</bundles_post_ra>
